<compile_context>
chip_gen: v5e
topology: v5e:2x2
jax: 0.10.0
libtpu: 0.0.40
codegen_flags: <defaults>
</compile_context>

<pallas_src>
import functools

import jax
import jax.numpy as jnp
from jax.experimental import pallas as pl
from jax.experimental.pallas import tpu as pltpu

EPS = 1e-7


def _cdiv(a, b):
    return -(-a // b)


def _int_pow(x, p):
    """x**p for integer p >= 1 via exponentiation-by-squaring (VALU only)."""
    if p == 1:
        return x
    h = _int_pow(x, p // 2)
    h2 = h * h
    return h2 if (p % 2 == 0) else h2 * x


def _normalize_kernel(power, x_ref, o_ref):
    # Block: (n_blk, C, tile_hw).  All math is per (batch, spatial) column.
    x_in = x_ref[...]
    x = x_in.astype(jnp.float32)  # accumulate in f32 for accuracy

    if power == 2:
        s = jnp.sum(x * x, axis=1, keepdims=True)
        norm = jnp.sqrt(s)
    elif power == 1:
        # Matches the module: x.pow(1).sum(1) (no abs).
        norm = jnp.sum(x, axis=1, keepdims=True)
    elif isinstance(power, int) and power > 2:
        s = jnp.sum(_int_pow(x, power), axis=1, keepdims=True)
        norm = jnp.power(s, 1.0 / power)
    else:
        # General / non-integer power fallback.
        s = jnp.sum(jnp.power(x, power), axis=1, keepdims=True)
        norm = jnp.power(s, 1.0 / power)

    # Reciprocal of (n_blk, 1, tile_hw) only — far cheaper than C*HW divides.
    inv = pl.reciprocal(norm + EPS, approx=False)

    if x_in.dtype == jnp.float32:
        o_ref[...] = x * inv
    else:
        # Keep the scaling in the narrow dtype: avoids a second full-width f32
        # copy of the block on the output path (v6e/v7x have bf16 VALU).
        o_ref[...] = (x_in * inv.astype(x_in.dtype)).astype(o_ref.dtype)


def _vmem_limits():
    """(vmem_limit_bytes, block_buffer_budget) gated by chip generation."""
    try:
        cap = int(pltpu.get_tpu_info().vmem_capacity_bytes)
    except Exception:
        cap = 64 << 20  # conservative: assume the smallest (v7x per-TC) part
    # Leave >= 16 MiB of physical VMEM as headroom for compiler scratch.
    vmem_limit = max(32 << 20, min(cap - (16 << 20), 64 << 20))
    # 2 input + 2 output double-buffered block copies must fit this budget.
    block_budget = (vmem_limit * 3) // 8
    return vmem_limit, block_budget


def _choose_blocks(n, c, hw, itemsize, per_block_budget):
    """Pick (n_blk, tile_hw, spatial_tiles), dtype/sublane/VMEM aware."""
    sub = 32 // itemsize                     # sublanes per packed row: 8/16/32
    padded_c = _cdiv(c, sub) * sub           # VMEM pads C up to a sublane tile
    lane_hw = _cdiv(hw, 128) * 128           # resident lanes for a full-HW block
    bytes_per_col = padded_c * itemsize      # per lane column, per batch element

    # Prefer a single full-HW tile: each channel row is one contiguous DMA run,
    # and tile_hw == full extent is legal even when HW % 128 != 0.
    if bytes_per_col * lane_hw <= per_block_budget:
        tile_hw = hw
        resident_hw = lane_hw
    else:
        tile_hw = max(128, (per_block_budget // (bytes_per_col * 128)) * 128)
        tile_hw = min(tile_hw, lane_hw)
        resident_hw = tile_hw
    spatial_tiles = _cdiv(hw, tile_hw)       # ragged tail masked by Pallas

    # Fold batch into the block when C is small so each block is ~1-2 MiB
    # (amortizes the ~0.35 us per-step overhead and tiny-DMA inefficiency).
    block_bytes_1 = max(bytes_per_col * resident_hw, 1)
    target = 2 << 20
    n_blk = max(1, min(n, target // block_bytes_1))
    n_blk = max(1, min(n_blk, per_block_budget // block_bytes_1))

    # Keep >= ~8 grid steps when the problem has them, so both v7x TensorCores
    # get work under ("parallel", "parallel").
    min_steps = 8
    if spatial_tiles < min_steps:
        need_batch_blocks = _cdiv(min_steps, spatial_tiles)
        if n >= need_batch_blocks:
            n_blk = min(n_blk, max(1, n // need_batch_blocks))
    return n_blk, tile_hw, spatial_tiles


def normalize(x, power=2):
    """x: NCHW array. Returns x / (||x||_p over channel dim + 1e-7), same shape."""
    n, c, h, w = x.shape
    hw = h * w
    x3 = x.reshape(n, c, hw)  # glue reshape; all compute stays in the kernel
    itemsize = x.dtype.itemsize

    vmem_limit, block_budget = _vmem_limits()
    n_blk, tile_hw, spatial_tiles = _choose_blocks(
        n, c, hw, itemsize, block_budget // 4)
    grid = (_cdiv(n, n_blk), spatial_tiles)

    try:
        cost = pl.CostEstimate(flops=3 * n * c * hw,
                               transcendentals=2 * n * hw,
                               bytes_accessed=2 * n * c * hw * itemsize)
    except Exception:
        cost = None

    out3 = pl.pallas_call(
        functools.partial(_normalize_kernel, power),
        out_shape=jax.ShapeDtypeStruct((n, c, hw), x.dtype),
        grid_spec=pltpu.PrefetchScalarGridSpec(
            num_scalar_prefetch=0,
            grid=grid,
            in_specs=[pl.BlockSpec((n_blk, c, tile_hw), lambda b, s: (b, 0, s))],
            out_specs=pl.BlockSpec((n_blk, c, tile_hw), lambda b, s: (b, 0, s)),
        ),
        compiler_params=pltpu.CompilerParams(
            dimension_semantics=("parallel", "parallel"),
            vmem_limit_bytes=vmem_limit),
        cost_estimate=cost,
    )(x3)

    return out3.reshape(n, c, h, w)


def normalize_ref(x, power=2):
    # Exact PyTorch-module semantics (no abs, eps added).
    norm = jnp.power(jnp.sum(jnp.power(x, power), axis=1, keepdims=True),
                     1.0 / power)
    return x / (norm + EPS)


if __name__ == "__main__":
    key = jax.random.PRNGKey(0)

    # Primary check: module-typical NCHW shape.
    x = jax.random.normal(key, (2, 4, 16, 16), dtype=jnp.float32)
    out = jax.block_until_ready(normalize(x, power=2))
    ref = normalize_ref(x, power=2)
    assert out.shape == x.shape and out.dtype == x.dtype
    assert jnp.allclose(out, ref, atol=1e-5, rtol=1e-5), "mismatch vs reference"

    # Ragged-HW check: HW not a multiple of 128 exercises the no-pad path
    # (full-extent block, masked partial stores).
    x2 = jax.random.normal(jax.random.PRNGKey(0), (2, 3, 10, 10),
                           dtype=jnp.float32)
    out2 = jax.block_until_ready(normalize(x2, power=2))
    assert jnp.allclose(out2, normalize_ref(x2, power=2),
                        atol=1e-5, rtol=1e-5), "mismatch vs reference (ragged)"

    print("KERNEL_OK")
</pallas_src>

<mosaic_0001>
module attributes {stable_mosaic.version = 11 : i64} {
  func.func @_normalize_kernel(%arg0: i32, %arg1: i32, %arg2: memref<2x4x256xf32, #tpu.memory_space<vmem>>, %arg3: memref<2x4x256xf32, #tpu.memory_space<vmem>>) attributes {dimension_semantics = [#tpu.dimension_semantics<parallel>, #tpu.dimension_semantics<parallel>], iteration_bounds = array<i64: 1, 1>, scalar_prefetch = 0 : i64, scratch_operands = 0 : i64, tpu.core_type = #tpu.core_type<tc>, window_params = [{transform_indices = @transform_0, window_bounds = array<i64: 2, 4, 256>}, {transform_indices = @transform_1, window_bounds = array<i64: 2, 4, 256>}]} {
    %c0 = arith.constant 0 : index
    %c0_0 = arith.constant 0 : index
    %c0_1 = arith.constant 0 : index
    %0 = vector.load %arg2[%c0, %c0_0, %c0_1] : memref<2x4x256xf32, #tpu.memory_space<vmem>>, vector<2x4x256xf32>
    %1 = arith.mulf %0, %0 : vector<2x4x256xf32>
    %cst = arith.constant dense<0.000000e+00> : vector<2x256xf32>
    %2 = vector.multi_reduction <add>, %1, %cst [1] : vector<2x4x256xf32> to vector<2x256xf32>
    %3 = vector.shape_cast %2 : vector<2x256xf32> to vector<2x1x256xf32>
    %4 = math.sqrt %3 : vector<2x1x256xf32>
    %cst_2 = arith.constant 1.000000e-07 : f32
    %5 = vector.broadcast %cst_2 : f32 to vector<2x1x256xf32>
    %6 = arith.addf %4, %5 : vector<2x1x256xf32>
    %7 = tpu.reciprocal %6 : vector<2x1x256xf32> -> vector<2x1x256xf32>
    %8 = vector.broadcast %7 : vector<2x1x256xf32> to vector<2x4x256xf32>
    %9 = arith.mulf %0, %8 : vector<2x4x256xf32>
    %c0_3 = arith.constant 0 : index
    %c0_4 = arith.constant 0 : index
    %c0_5 = arith.constant 0 : index
    %10 = vector.load %arg3[%c0_3, %c0_4, %c0_5] : memref<2x4x256xf32, #tpu.memory_space<vmem>>, vector<2x4x256xf32>
    tpu.vector_store %arg3[%c0_3, %c0_4, %c0_5], %9 {strides = array<i32>} : memref<2x4x256xf32, #tpu.memory_space<vmem>>, vector<2x4x256xf32>,
    return
  }
  func.func @transform_0(%arg0: i32, %arg1: i32) -> (i32, i32, i32) {
    %c0_i32 = arith.constant 0 : i32
    %c0_i32_0 = arith.constant 0 : i32
    return %arg0, %c0_i32, %arg1 : i32, i32, i32
  }
  func.func @transform_1(%arg0: i32, %arg1: i32) -> (i32, i32, i32) {
    %c0_i32 = arith.constant 0 : i32
    %c0_i32_0 = arith.constant 0 : i32
    return %arg0, %c0_i32, %arg1 : i32, i32, i32
  }
}

</mosaic_0001>

<bundles_post_ra>
// kernel: tpu_custom_call.1
= control target key start
LH: loop header
LB: loop body
LE: loop exit
PB: predicated region body
PF: predicated region fallthrough
CT: control target
= control target key end

     0   :  { %6 = vsyncpa [#allocation3], 0  ;;  %s344_s0 = inlined_call_operand.hbm [shape: f32[2,4,256], index: 0, kind: input, shape index: {}]   ;;  %s345_s1 = inlined_call_operand.hbm [shape: f32[2,4,256], index: 1, kind: output, shape index: {}]  }
   0x1   :  { %7 = vsyncpa [#allocation4], 0  ;;  %s12_s8 = sshll.u32 %s344_s0, 4  ;;  %s284_s9 = smov [#allocation2]   ;;  %s13_s8 = int_to_ptr.hbm [resolvable:$true] %s12_s8 }
   0x2   :  { %s14_s10 = sshll.u32 %s284_s9, 4  ;;  %s285_s11 = smov 128   ;;  %s15_s10 = int_to_ptr.vmem [resolvable:$true] %s14_s10 }
   0x3   :  { %s286_s12 = smov 8  }
   0x4   :  { %20 = dma.hbm_to_vmem [thread:$0]  %s13_s8, 256, %s15_s10, [#allocation3], %s285_s11, %s285_s11, %s286_s12  }
   0x5   :  { %280 = dma.done.wait [#allocation3], 256  }
   0x6   :  { %281 = vsyncadd [#allocation3], 4294967040  ;;  %v304_v0 = vld [vmem:[#allocation2] sm:$0xff]  ;;  %v306_v1 = vld [vmem:[#allocation2 + $0x8] sm:$0xff]  ;;  %vm42_vm0 = vcmask 1043456   ;;  %s287_s0 = smov [#allocation5]  }
   0x7   :  { %v27_v2 = vmul.f32 %v304_v0, %v304_v0  ;;  %v28_v3 = vmul.f32 %v306_v1, %v306_v1  ;;  %s197_s13 = sshll.u32 %s287_s0, 4  ;;  %s199_s16 = sshll.u32 %s345_s1, 4  ;;  %s198_s13 = int_to_ptr.vmem [resolvable:$true] %s197_s13  ;;  %s200_s16 = int_to_ptr.hbm [resolvable:$true] %s199_s16 }
   0x9   :  { %31 = vst [vmem:[#allocation1] ss:$2 sm:$0xff] %v27_v2 }
   0xa   :  { %35 = vst [vmem:[#allocation1 + $0x10] ss:$2 sm:$0xff] %v28_v3 }
  0x10   :  { %v32_v4 = vld.sshfl [vmem:[#allocation1] sm:$0xff pattern:$0x75316420]  ;;  %v33_v5 = vld.sshfl [vmem:[#allocation1 + $0x8] sm:$0xff pattern:$0x75316420] }
  0x11   :  { %v36_v6 = vld.sshfl [vmem:[#allocation1 + $0x10] sm:$0xff pattern:$0x75316420]  ;;  %v37_v7 = vld.sshfl [vmem:[#allocation1 + $0x18] sm:$0xff pattern:$0x75316420] }
  0x12   :  { %v43_v8 = vsel %vm42_vm0, %v32_v4, 0.0  ;;  %v50_v9 = vsel %vm42_vm0, %v33_v5, 0.0  ;;  %v57_v10 = vsel %vm42_vm0, %v36_v6, 0.0  ;;  %v64_v11 = vsel %vm42_vm0, %v37_v7, 0.0 }
  0x13   :  { %v44_v12 = vrot.slane %v43_v8, 4  ;;  %v51_v13 = vrot.slane %v50_v9, 4  ;;  %v58_v14 = vrot.slane %v57_v10, 4  ;;  %v65_v15 = vrot.slane %v64_v11, 4 }
  0x15   :  { %v45_v16 = vadd.f32 %v44_v12, %v43_v8  ;;  %v52_v17 = vadd.f32 %v51_v13, %v50_v9  ;;  %v59_v18 = vadd.f32 %v58_v14, %v57_v10  ;;  %v66_v19 = vadd.f32 %v65_v15, %v64_v11 }
  0x17   :  { %v46_v20 = vrot.slane %v45_v16, 2  ;;  %v53_v21 = vrot.slane %v52_v17, 2  ;;  %v60_v22 = vrot.slane %v59_v18, 2  ;;  %v67_v23 = vrot.slane %v66_v19, 2 }
  0x19   :  { %v47_v24 = vadd.f32 %v46_v20, %v45_v16  ;;  %v54_v25 = vadd.f32 %v53_v21, %v52_v17  ;;  %v61_v26 = vadd.f32 %v60_v22, %v59_v18  ;;  %v68_v27 = vadd.f32 %v67_v23, %v66_v19 }
  0x1b   :  { %v48_v28 = vrot.slane %v47_v24, 1  ;;  %v55_v29 = vrot.slane %v54_v25, 1  ;;  %v62_v30 = vrot.slane %v61_v26, 1  ;;  %v69_v31 = vrot.slane %v68_v27, 1 }
  0x1d   :  { %v49_v32 = vadd.f32 %v48_v28, %v47_v24  ;;  %v56_v33 = vadd.f32 %v55_v29, %v54_v25  ;;  %v63_v34 = vadd.f32 %v62_v30, %v61_v26  ;;  %v70_v35 = vadd.f32 %v69_v31, %v68_v27 }
  0x1f   :  { %216 = vrsqrt.f32 %v49_v32  ;;  %vm78_vm1 = vcmp.eq.f32.partialorder %v49_v32, inf  ;;  %vm80_vm2 = vcmp.eq.f32.partialorder %v49_v32, 0.0  ;;  %v81_v59 = vand.u32 2147483648, %v49_v32 }
  0x20   :  { %218 = vrsqrt.f32 %v56_v33  ;;  %vm90_vm3 = vcmp.eq.f32.partialorder %v56_v33, inf  ;;  %vm92_vm4 = vcmp.eq.f32.partialorder %v56_v33, 0.0  ;;  %v93_v62 = vand.u32 2147483648, %v56_v33 }
  0x21   :  { %220 = vrsqrt.f32 %v63_v34  ;;  %vm102_vm5 = vcmp.eq.f32.partialorder %v63_v34, inf  ;;  %vm104_vm6 = vcmp.eq.f32.partialorder %v63_v34, 0.0  ;;  %v105_v6 = vand.u32 2147483648, %v63_v34 }
  0x22   :  { %222 = vrsqrt.f32 %v70_v35  ;;  %vm114_vm7 = vcmp.eq.f32.partialorder %v70_v35, inf  ;;  %v117_v14 = vand.u32 2147483648, %v70_v35  ;;  %vm116_vm8 = vcmp.eq.f32.partialorder %v70_v35, 0.0 }
  0x25   :  { %v217_v36 = vpop.eup %216 }
  0x26   :  { %v219_v37 = vpop.eup %218  ;;  %v72_v38 = vmul.f32 %v217_v36, %v49_v32 }
  0x27   :  { %v221_v39 = vpop.eup %220  ;;  %v84_v40 = vmul.f32 %v219_v37, %v56_v33 }
  0x28   :  { %v223_v41 = vpop.eup %222  ;;  %v73_v42 = vmul.f32 %v217_v36, %v72_v38  ;;  %v96_v43 = vmul.f32 %v221_v39, %v63_v34 }
  0x29   :  { %v85_v44 = vmul.f32 %v219_v37, %v84_v40  ;;  %v108_v45 = vmul.f32 %v223_v41, %v70_v35 }
  0x2a   :  { %v74_v46 = vmul.f32 0.5, %v73_v42  ;;  %v97_v47 = vmul.f32 %v221_v39, %v96_v43 }
  0x2b   :  { %v86_v48 = vmul.f32 0.5, %v85_v44  ;;  %v109_v49 = vmul.f32 %v223_v41, %v108_v45 }
  0x2c   :  { %v75_v50 = vsub.f32 1.5, %v74_v46  ;;  %v98_v51 = vmul.f32 0.5, %v97_v47 }
  0x2d   :  { %v87_v52 = vsub.f32 1.5, %v86_v48  ;;  %v110_v53 = vmul.f32 0.5, %v109_v49 }
  0x2e   :  { %v76_v54 = vmul.f32 %v217_v36, %v75_v50  ;;  %v99_v55 = vsub.f32 1.5, %v98_v51 }
  0x2f   :  { %v88_v56 = vmul.f32 %v219_v37, %v87_v52  ;;  %v111_v57 = vsub.f32 1.5, %v110_v53 }
  0x30   :  { %v77_v58 = vmul.f32 %v76_v54, %v49_v32  ;;  %v100_v60 = vmul.f32 %v221_v39, %v99_v55 }
  0x31   :  { %v89_v61 = vmul.f32 %v88_v56, %v56_v33  ;;  %v112_v63 = vmul.f32 %v223_v41, %v111_v57 }
  0x32   :  { %v79_v2 = vsel %vm78_vm1, %v49_v32, %v77_v58  ;;  %v101_v3 = vmul.f32 %v100_v60, %v63_v34 }
  0x33   :  { %v82_v4 = vsel %vm80_vm2, %v81_v59, %v79_v2  ;;  %v91_v5 = vsel %vm90_vm3, %v56_v33, %v89_v61  ;;  %v113_v7 = vmul.f32 %v112_v63, %v70_v35 }
  0x34   :  { %v94_v8 = vsel %vm92_vm4, %v93_v62, %v91_v5  ;;  %v119_v9 = vadd.f32 1e-07, %v82_v4  ;;  %v103_v10 = vsel %vm102_vm5, %v63_v34, %v101_v3 }
  0x35   :  { %v120_v11 = vadd.f32 1e-07, %v94_v8  ;;  %v106_v12 = vsel %vm104_vm6, %v105_v6, %v103_v10  ;;  %v115_v13 = vsel %vm114_vm7, %v70_v35, %v113_v7 }
  0x36   :  { %224 = vrcp.f32 %v119_v9  ;;  %v118_v15 = vsel %vm116_vm8, %v117_v14, %v115_v13  ;;  %v121_v16 = vadd.f32 1e-07, %v106_v12  ;;  %v132_v23 = vand.u32 2147483647, %v119_v9 }
  0x37   :  { %226 = vrcp.f32 %v120_v11  ;;  %v122_v17 = vadd.f32 1e-07, %v118_v15  ;;  %v134_v24 = vand.u32 2147483648, %v119_v9  ;;  %v146_v27 = vand.u32 2147483647, %v120_v11 }
  0x38   :  { %228 = vrcp.f32 %v121_v16  ;;  %v148_v28 = vand.u32 2147483648, %v120_v11  ;;  %vm128_vm9 = vweird.f32 %v119_v9  ;;  %vm142_vm11 = vweird.f32 %v120_v11 }
  0x39   :  { %230 = vrcp.f32 %v122_v17  ;;  %vm316_vm13 = vcmp.eq.f32.partialorder %v132_v23, 8.507059e+37  ;;  %v135_v36 = vor.u32 1.1754944e-38, %v134_v24  ;;  %vm147_vm15 = vcmp.eq.f32.partialorder %v146_v27, 8.507059e+37 }
  0x3a   :  { %v149_v40 = vor.u32 1.1754944e-38, %v148_v28  ;;  %v174_v43 = vand.u32 2147483647, %v122_v17  ;;  %v176_v44 = vand.u32 2147483648, %v122_v17  ;;  %vm156_vm4 = vweird.f32 %v121_v16 }
  0x3b   :  { %v162_v50 = vand.u32 2147483648, %v121_v16  ;;  %v160_v53 = vand.u32 2147483647, %v121_v16  ;;  %vm170_vm6 = vweird.f32 %v122_v17 }
  0x3c   :  { %v225_v18 = vpop.eup %224  ;;  %v177_v56 = vor.u32 1.1754944e-38, %v176_v44  ;;  %vm175_vm8 = vcmp.eq.f32.partialorder %v174_v43, 8.507059e+37 }
  0x3d   :  { %v227_v19 = vpop.eup %226  ;;  %v124_v20 = vmul.f32 %v225_v18, %v119_v9  ;;  %vm129_vm10 = vweird.f32 %v225_v18  ;;  %v163_v61 = vor.u32 1.1754944e-38, %v162_v50 }
  0x3e   :  { %v138_v21 = vmul.f32 %v227_v19, %v120_v11  ;;  %v229_v25 = vpop.eup %228  ;;  %vm143_vm12 = vweird.f32 %v227_v19  ;;  %vm320_vm14 = vmor %vm128_vm9, %vm129_vm10  ;;  %vm161_vm9 = vcmp.eq.f32.partialorder %v160_v53, 8.507059e+37 }
  0x3f   :  { %v125_v22 = vsub.f32 1.0, %v124_v20  ;;  %v231_v29 = vpop.eup %230  ;;  %v152_v31 = vmul.f32 %v229_v25, %v121_v16  ;;  %vm144_vm1 = vmor %vm142_vm11, %vm143_vm12  ;;  %vm157_vm2 = vweird.f32 %v229_v25 }
  0x40   :  { %v139_v26 = vsub.f32 1.0, %v138_v21  ;;  %v166_v33 = vmul.f32 %v231_v29, %v122_v17  ;;  %vm171_vm3 = vweird.f32 %v231_v29  ;;  %vm326_vm5 = vmor %vm156_vm4, %vm157_vm2 }
  0x41   :  { %v126_v30 = vmul.f32 %v225_v18, %v125_v22  ;;  %v153_v37 = vsub.f32 1.0, %v152_v31  ;;  %vm172_vm7 = vmor %vm170_vm6, %vm171_vm3 }
  0x42   :  { %v140_v32 = vmul.f32 %v227_v19, %v139_v26  ;;  %v167_v41 = vsub.f32 1.0, %v166_v33 }
  0x43   :  { %v127_v34 = vadd.f32 %v225_v18, %v126_v30  ;;  %v154_v42 = vmul.f32 %v229_v25, %v153_v37 }
  0x44   :  { %v141_v39 = vadd.f32 %v227_v19, %v140_v32  ;;  %v168_v47 = vmul.f32 %v231_v29, %v167_v41 }
  0x45   :  { %v131_v45 = vsel %vm320_vm14, %v225_v18, %v127_v34  ;;  %v155_v49 = vadd.f32 %v229_v25, %v154_v42 }
  0x46   :  { %v145_v46 = vsel %vm144_vm1, %v227_v19, %v141_v39  ;;  %v169_v54 = vadd.f32 %v231_v29, %v168_v47  ;;  %v136_v55 = vsel %vm316_vm13, %v135_v36, %v131_v45 }
  0x47   :  { %v150_v48 = vsel %vm147_vm15, %v149_v40, %v145_v46  ;;  %v159_v58 = vsel %vm326_vm5, %v229_v25, %v155_v49 }
  0x48   :  { %v183_v51 = vrot.slane %v150_v48, 4  ;;  %v173_v59 = vsel %vm172_vm7, %v231_v29, %v169_v54  ;;  %v164_v2 = vsel %vm161_vm9, %v163_v61, %v159_v58 }
  0x49   :  { %v178_v62 = vsel %vm175_vm8, %v177_v56, %v173_v59 }
  0x4a   :  { %v185_v57 = vsel %vm42_vm0, %v136_v55, %v183_v51  ;;  %v184_v63 = vrot.slane %v178_v62, 4 }
  0x4b   :  { %v189_v60 = vmul.f32 %v185_v57, %v304_v0 }
  0x4c   :  { %v186_v3 = vsel %vm42_vm0, %v164_v2, %v184_v63 }
  0x4d   :  { %191 = vst [vmem:[#allocation5] sm:$0xff] %v189_v60  ;;  %v190_v4 = vmul.f32 %v186_v3, %v306_v1 }
  0x4f   :  { %192 = vst [vmem:[#allocation5 + $0x8] sm:$0xff] %v190_v4 }
  0x50   :  { %205 = dma.vmem_to_hbm [thread:$0]  %s198_s13, 256, %s200_s16, [#allocation4], %s285_s11, %s285_s11, %s286_s12  }
  0x51   :  { %282 = dma.done.wait [#allocation4], 256  }
  0x52   :  { %283 = vsyncadd [#allocation4], 4294967040 }
  0x53   :  { %210 = vsyncpa [#allocation3], 1 }
  0x54   :  { %211 = vsyncpa [#allocation4], 1 }

</bundles_post_ra>
